<compile_context>
chip_gen: v7x
topology: tpu7x:2x2x1
jax: 0.10.0
libtpu: 0.0.40
codegen_flags: <defaults>
</compile_context>

<pallas_src>
import functools

import jax
import jax.numpy as jnp
from jax import lax
from jax.experimental import pallas as pl
from jax.experimental.pallas import tpu as pltpu

LANES = 128


def _cdiv(a, b):
    return -(-a // b)


def _round_up(x, m):
    return _cdiv(x, m) * m


def _sublane_pack(dtype):
    # Rows per native packed tile: f32 -> 8, bf16 -> 16, int8/fp8 -> 32.
    return max(8, 32 // jnp.dtype(dtype).itemsize)


def _tpu_hints():
    """Returns (num_tensorcores, max_tile_rows) with safe fallbacks."""
    num_cores = 1
    try:
        info = pltpu.get_tpu_info()
    except Exception:
        info = None
    if info is not None:
        # Only TensorCore-specific attribute names: generic "num_cores" style
        # fields could mean slice-wide core counts and mis-size the grid.
        for name in ("tensorcores_per_chip", "num_tensorcores",
                     "tensorcore_count", "num_tensor_cores"):
            v = getattr(info, name, None)
            if isinstance(v, int) and 1 <= v <= 16:
                num_cores = v
                break
    # v7x (2 TCs, 3.2 TB/s HBM): 8192-row f32 blocks = 4 MiB each; 2 inputs x
    # 2 buffers = 16 MiB, inside the 32 MiB default scoped-VMEM limit.
    # v5e/v6e (1 TC): 4096 rows keeps buffers at 8 MiB, under v5e's 16 MiB
    # default, and the per-step HBM time already dwarfs the step overhead.
    max_tile_rows = 8192 if num_cores >= 2 else 4096
    return num_cores, max_tile_rows


def _weighted_rmsf_kernel(yp_ref, yt_ref, out_ref, *, threshold, high_weight,
                          low_weight, tile_rows, tiles_per_core, valid_rows,
                          two_level, needs_mask):
    if two_level:
        c = pl.program_id(0)
        i = pl.program_id(1)
        slot = c * tiles_per_core + i
    else:
        i = pl.program_id(0)
        slot = i

    @pl.when(i == 0)
    def _():
        # Output block is resident across the inner (reduction) axis; it is
        # the accumulator (no VMEM scratch, no final copy).
        out_ref[...] = jnp.zeros_like(out_ref)

    yp = yp_ref[...].astype(jnp.float32)
    yt = yt_ref[...].astype(jnp.float32)

    # weights: high_weight where y_true > threshold, else low_weight
    w = jnp.where(yt > threshold,
                  jnp.float32(high_weight),
                  jnp.float32(low_weight))
    contrib = w * (yp - yt) ** 2

    if needs_mask:
        # Rows at/after `valid_rows` are block padding (unspecified contents)
        # or clamped re-reads from over-coverage grid slots: select them to
        # exactly 0.  True select — never multiply by a mask — so NaN/garbage
        # padding cannot leak in.
        row_ids = lax.broadcasted_iota(jnp.int32, contrib.shape, 0)
        remaining = valid_rows - slot * tile_rows
        contrib = jnp.where(row_ids < remaining, contrib, jnp.float32(0.0))
    # Any zero-padded (pred, true) tail pairs inside the last valid row
    # contribute exactly w*(0-0)^2 == 0, so no per-element mask is needed.

    # Sublane-folded partial reduction into the vreg-shaped accumulator
    # (VALU only; the cross-lane reduce happens once in the wrapper).
    out_ref[...] += jnp.sum(contrib.reshape(tile_rows // 8, 8, LANES), axis=0)


def weighted_rmsf_loss(y_pred, y_true, threshold=0.5, high_weight=2.0,
                       low_weight=1.0, *, max_tile_rows=None, num_cores=None):
    assert y_pred.shape == y_true.shape, (y_pred.shape, y_true.shape)
    n_valid = int(y_pred.size)
    assert n_valid > 0

    hint_cores, hint_tile = _tpu_hints()
    if num_cores is None:
        num_cores = hint_cores
    if max_tile_rows is None:
        max_tile_rows = hint_tile

    pack = max(_sublane_pack(y_pred.dtype), _sublane_pack(y_true.dtype))
    align = pack * LANES

    # Keep original dtype (bf16 inputs read half the HBM bytes); cast to f32
    # in-kernel.  ravel/reshape of contiguous arrays are free.
    flat_pred = jnp.ravel(y_pred)
    flat_true = jnp.ravel(y_true)

    if n_valid % align:
        # Only truly ragged sizes pay a copy, and only up to the next packed
        # sublane row (< pack*128 elements of zeros) so the free 2-D reshape
        # below is legal.  Aligned inputs are fed to the kernel zero-copy.
        total = _round_up(n_valid, align)
        flat_pred = jnp.pad(flat_pred, (0, total - n_valid))
        flat_true = jnp.pad(flat_true, (0, total - n_valid))
    else:
        total = n_valid

    rows = total // LANES                       # multiple of `pack` (>= 8)
    tile_rows = min(max_tile_rows, rows)
    tile_rows = max(pack, (tile_rows // pack) * pack)  # keep sublane packing
    num_blocks = _cdiv(rows, tile_rows)

    two_level = (num_cores >= 2) and (num_blocks >= 2)
    if two_level:
        # Explicit 2-TensorCore split (v7x): leading CORE_PARALLEL axis, one
        # (8, 128) partial-sum block per core.
        tiles_per_core = _cdiv(num_blocks, num_cores)
        grid = (num_cores, tiles_per_core)
        total_slots = num_cores * tiles_per_core
        semantics = (pltpu.CORE_PARALLEL, pltpu.ARBITRARY)
        last_block = num_blocks - 1

        def in_map(c, i):
            # Clamp over-coverage slots so the DMA stays in bounds; their
            # contribution is zeroed by the in-kernel row mask.
            return (jnp.minimum(c * tiles_per_core + i, last_block), 0)

        out_spec = pl.BlockSpec((8, LANES), lambda c, i: (c, 0))
        out_rows = num_cores * 8
    else:
        # Single-TC chips (v5e/v6e): one streaming reduction axis, no extra
        # grid level, no extra writeback.
        num_cores = 1
        tiles_per_core = num_blocks
        grid = (num_blocks,)
        total_slots = num_blocks
        semantics = ("arbitrary",)

        def in_map(i):
            return (i, 0)

        out_spec = pl.BlockSpec((8, LANES), lambda i: (0, 0))
        out_rows = 8

    needs_mask = (rows % tile_rows != 0) or (total_slots != num_blocks)

    pred2d = flat_pred.reshape(rows, LANES)
    true2d = flat_true.reshape(rows, LANES)

    kernel = functools.partial(
        _weighted_rmsf_kernel,
        threshold=float(threshold),
        high_weight=float(high_weight),
        low_weight=float(low_weight),
        tile_rows=tile_rows,
        tiles_per_core=tiles_per_core,
        valid_rows=rows,
        two_level=two_level,
        needs_mask=needs_mask,
    )

    partials = pl.pallas_call(
        kernel,
        out_shape=jax.ShapeDtypeStruct((out_rows, LANES), jnp.float32),
        grid_spec=pltpu.PrefetchScalarGridSpec(
            num_scalar_prefetch=0,
            grid=grid,
            in_specs=[
                pl.BlockSpec((tile_rows, LANES), in_map),
                pl.BlockSpec((tile_rows, LANES), in_map),
            ],
            out_specs=out_spec,
        ),
        compiler_params=pltpu.CompilerParams(dimension_semantics=semantics),
    )(pred2d, true2d)

    # Final cross-lane reduction + mean divide on the tiny partial-sum slab.
    return jnp.sum(partials) / jnp.float32(n_valid)


def _reference(y_pred, y_true, threshold=0.5, high_weight=2.0, low_weight=1.0):
    yt = y_true.astype(jnp.float32)
    yp = y_pred.astype(jnp.float32)
    w = jnp.where(yt > threshold, high_weight, low_weight).astype(jnp.float32)
    return jnp.mean(w * (yp - yt) ** 2)


if __name__ == "__main__":
    key = jax.random.PRNGKey(0)
    keys = jax.random.split(key, 8)

    # RMSF-style inputs (batch=2, channels=4, spatial=16, spatial=16):
    # 2048 elements -> zero-copy aligned path.
    shape = (2, 4, 16, 16)
    y_pred = jax.random.uniform(keys[0], shape, dtype=jnp.float32)
    y_true = jax.random.uniform(keys[1], shape, dtype=jnp.float32)
    loss = jax.block_until_ready(weighted_rmsf_loss(y_pred, y_true))
    ref = _reference(y_pred, y_true)
    assert jnp.allclose(loss, ref, rtol=1e-5, atol=1e-6), (loss, ref)

    # Ragged size (105 elements): minimal zero-pad path.
    yp2 = jax.random.uniform(keys[2], (3, 7, 5), dtype=jnp.float32)
    yt2 = jax.random.uniform(keys[3], (3, 7, 5), dtype=jnp.float32)
    loss2 = jax.block_until_ready(weighted_rmsf_loss(yp2, yt2))
    ref2 = _reference(yp2, yt2)
    assert jnp.allclose(loss2, ref2, rtol=1e-5, atol=1e-6), (loss2, ref2)

    # bf16 inputs (half HBM bytes; 16-row sublane packing), 4096 elements.
    yp3 = jax.random.uniform(keys[4], (2, 8, 16, 16), dtype=jnp.float32)
    yt3 = jax.random.uniform(keys[5], (2, 8, 16, 16), dtype=jnp.float32)
    loss3 = jax.block_until_ready(
        weighted_rmsf_loss(yp3.astype(jnp.bfloat16), yt3.astype(jnp.bfloat16)))
    ref3 = _reference(yp3.astype(jnp.bfloat16), yt3.astype(jnp.bfloat16))
    assert jnp.allclose(loss3, ref3, rtol=1e-4, atol=1e-5), (loss3, ref3)

    # Multi-block grid with a ragged last block (forces the in-kernel row-mask
    # path via a deliberately tiny tile): 24 rows, 16-row tiles.
    yp4 = jax.random.uniform(keys[6], (3, 8, 128), dtype=jnp.float32)
    yt4 = jax.random.uniform(keys[7], (3, 8, 128), dtype=jnp.float32)
    loss4 = jax.block_until_ready(
        weighted_rmsf_loss(yp4, yt4, max_tile_rows=16))
    ref4 = _reference(yp4, yt4)
    assert jnp.allclose(loss4, ref4, rtol=1e-5, atol=1e-6), (loss4, ref4)

    print("KERNEL_OK")
</pallas_src>

<mosaic_0001>
module attributes {stable_mosaic.version = 11 : i64} {
  func.func @_weighted_rmsf_kernel(%arg0: i32, %arg1: memref<16x128xf32, #tpu.memory_space<vmem>>, %arg2: memref<16x128xf32, #tpu.memory_space<vmem>>, %arg3: memref<8x128xf32, #tpu.memory_space<vmem>>) attributes {dimension_semantics = [#tpu.dimension_semantics<arbitrary>], iteration_bounds = array<i64: 1>, scalar_prefetch = 0 : i64, scratch_operands = 0 : i64, tpu.core_type = #tpu.core_type<tc>, window_params = [{transform_indices = @transform_0, window_bounds = array<i64: 16, 128>}, {transform_indices = @transform_1, window_bounds = array<i64: 16, 128>}, {pipeline_mode = #tpu.pipeline_mode<synchronous>, transform_indices = @transform_2, window_bounds = array<i64: 8, 128>}]} {
    %c0_i32 = arith.constant 0 : i32
    %0 = arith.cmpi eq, %arg0, %c0_i32 : i32
    %1 = arith.extui %0 : i1 to i32
    %c0_i32_0 = arith.constant 0 : i32
    %2 = arith.cmpi ne, %1, %c0_i32_0 : i32
    scf.if %2 {
      %cst_11 = arith.constant 0.000000e+00 : f32
      %18 = vector.broadcast %cst_11 : f32 to vector<8x128xf32>
      %c0_12 = arith.constant 0 : index
      %c0_13 = arith.constant 0 : index
      %19 = vector.load %arg3[%c0_12, %c0_13] : memref<8x128xf32, #tpu.memory_space<vmem>>, vector<8x128xf32>
      tpu.vector_store %arg3[%c0_12, %c0_13], %18 {strides = array<i32>} : memref<8x128xf32, #tpu.memory_space<vmem>>, vector<8x128xf32>,
    } else {
    }
    %c0 = arith.constant 0 : index
    %c0_1 = arith.constant 0 : index
    %3 = vector.load %arg1[%c0, %c0_1] : memref<16x128xf32, #tpu.memory_space<vmem>>, vector<16x128xf32>
    %c0_2 = arith.constant 0 : index
    %c0_3 = arith.constant 0 : index
    %4 = vector.load %arg2[%c0_2, %c0_3] : memref<16x128xf32, #tpu.memory_space<vmem>>, vector<16x128xf32>
    %cst = arith.constant 5.000000e-01 : f32
    %5 = vector.broadcast %cst : f32 to vector<16x128xf32>
    %6 = arith.cmpf ogt, %4, %5 : vector<16x128xf32>
    %cst_4 = arith.constant 2.000000e+00 : f32
    %cst_5 = arith.constant 1.000000e+00 : f32
    %7 = vector.broadcast %cst_4 : f32 to vector<16x128xf32>
    %8 = vector.broadcast %cst_5 : f32 to vector<16x128xf32>
    %9 = arith.select %6, %7, %8 : vector<16x128xi1>, vector<16x128xf32>
    %10 = arith.subf %3, %4 : vector<16x128xf32>
    %11 = arith.mulf %10, %10 : vector<16x128xf32>
    %12 = arith.mulf %9, %11 : vector<16x128xf32>
    %c0_6 = arith.constant 0 : index
    %c0_7 = arith.constant 0 : index
    %13 = vector.load %arg3[%c0_6, %c0_7] : memref<8x128xf32, #tpu.memory_space<vmem>>, vector<8x128xf32>
    %14 = vector.shape_cast %12 : vector<16x128xf32> to vector<2x8x128xf32>
    %cst_8 = arith.constant dense<0.000000e+00> : vector<8x128xf32>
    %15 = vector.multi_reduction <add>, %14, %cst_8 [0] : vector<2x8x128xf32> to vector<8x128xf32>
    %16 = arith.addf %13, %15 : vector<8x128xf32>
    %c0_9 = arith.constant 0 : index
    %c0_10 = arith.constant 0 : index
    %17 = vector.load %arg3[%c0_9, %c0_10] : memref<8x128xf32, #tpu.memory_space<vmem>>, vector<8x128xf32>
    tpu.vector_store %arg3[%c0_9, %c0_10], %16 {strides = array<i32>} : memref<8x128xf32, #tpu.memory_space<vmem>>, vector<8x128xf32>,
    return
  }
  func.func @transform_0(%arg0: i32) -> (i32, i32) {
    %c0_i32 = arith.constant 0 : i32
    %c0_i32_0 = arith.constant 0 : i32
    return %arg0, %c0_i32 : i32, i32
  }
  func.func @transform_1(%arg0: i32) -> (i32, i32) {
    %c0_i32 = arith.constant 0 : i32
    %c0_i32_0 = arith.constant 0 : i32
    return %arg0, %c0_i32 : i32, i32
  }
  func.func @transform_2(%arg0: i32) -> (i32, i32) {
    %c0_i32 = arith.constant 0 : i32
    %c0_i32_0 = arith.constant 0 : i32
    %c0_i32_1 = arith.constant 0 : i32
    return %c0_i32, %c0_i32_0 : i32, i32
  }
}

</mosaic_0001>

<bundles_post_ra>
// kernel: tpu_custom_call.1
= control target key start
LH: loop header
LB: loop body
LE: loop exit
PB: predicated region body
PF: predicated region fallthrough
CT: control target
= control target key end

     0   :  { %7 = vsyncpa [#allocation3], 0  ;;  %s215_s0 = inlined_call_operand.hbm [shape: f32[16,128], index: 0, kind: input, shape index: {}]   ;;  %s216_s1 = inlined_call_operand.hbm [shape: f32[16,128], index: 1, kind: input, shape index: {}]   ;;  %s217_s2 = inlined_call_operand.hbm [shape: f32[8,128], index: 2, kind: output, shape index: {}]  }
   0x1   :  { %8 = vsyncpa [#allocation6], 0 }
   0x2   :  { %9 = vsyncpa [#allocation4], 0  ;;  %s158_s9 = smov [#allocation2]   ;;  %s86_s13 = scalar_lea.hbm %s215_s0, 256 }
   0x3   :  { %s15_s10 = sshll.u32 %s158_s9, 4  ;;  %p87_p0 = scmp.ne.s32.totalorder %s215_s0, %s86_s13  ;;  %s16_s10 = int_to_ptr.vmem [resolvable:$true] %s15_s10 }
   0x4   :  { %p90_p1 = scmp.lt.u32.totalorder %s86_s13, %s215_s0 }
   0x6   :  { %p92_p2 = pnand %p90_p1, %p87_p0 }
   0x8   :  { %95 = shalt.err (!%p92_p2)
}
   0x9   :  { %s96_s18 = scalar_lea.vmem %s16_s10, 256  ;;  %p101_p4 = scmp.lt.s32.totalorder %s16_s10, %s16_s10 }
   0xa   :  { %p97_p3 = scmp.ne.s32.totalorder %s16_s10, %s96_s18  ;;  %p102_p5 = scmp.lt.s32.totalorder %s96_s18, %s96_s18 }
   0xc   :  { %p103_p6 = por %p102_p5, %p101_p4 }
   0xe   :  { %p104_p7 = pnand %p103_p6, %p97_p3 }
  0x10   :  { %107 = shalt.err (!%p104_p7)
}
  0x11   :  { %s159_s19 = smov 128   ;;  %s160_s20 = smov 8  }
  0x12   :  { %21 = dma.hbm_to_vmem [thread:$0]  %s215_s0, 256, %s16_s10, [#allocation3], %s159_s19, %s159_s19, %s160_s20  }
  0x13   :  { %s161_s23 = smov [#allocation5]   ;;  %s108_s27 = scalar_lea.hbm %s216_s1, 256 }
  0x14   :  { %s27_s24 = sshll.u32 %s161_s23, 4  ;;  %p109_p8 = scmp.ne.s32.totalorder %s216_s1, %s108_s27  ;;  %s28_s24 = int_to_ptr.vmem [resolvable:$true] %s27_s24 }
  0x15   :  { %p112_p9 = scmp.lt.u32.totalorder %s108_s27, %s216_s1 }
  0x17   :  { %p114_p10 = pnand %p112_p9, %p109_p8 }
  0x19   :  { %117 = shalt.err (!%p114_p10)
}
  0x1a   :  { %s118_s4 = scalar_lea.vmem %s28_s24, 256  ;;  %p123_p12 = scmp.lt.s32.totalorder %s28_s24, %s28_s24 }
  0x1b   :  { %p119_p11 = scmp.ne.s32.totalorder %s28_s24, %s118_s4  ;;  %p124_p13 = scmp.lt.s32.totalorder %s118_s4, %s118_s4 }
  0x1d   :  { %p125_p0 = por %p124_p13, %p123_p12 }
  0x1f   :  { %p126_p1 = pnand %p125_p0, %p119_p11 }
  0x21   :  { %129 = shalt.err (!%p126_p1)
}
  0x22   :  { %33 = dma.hbm_to_vmem [thread:$0]  %s216_s1, 256, %s28_s24, [#allocation6], %s159_s19, %s159_s19, %s160_s20  }
  0x23   :  { %152 = dma.done.wait [#allocation3], 256  }
  0x24   :  { %153 = vsyncadd [#allocation3], 4294967040 }
  0x25   :  { %154 = dma.done.wait [#allocation6], 256  }
  0x26   :  { %155 = vsyncadd [#allocation6], 4294967040  ;;  %v45_v0 = vld [vmem:[#allocation2] sm:$0xff]  ;;  %v46_v1 = vld [vmem:[#allocation2 + $0x8] sm:$0xff]  ;;  %v162_v5 = vmov 1.0   ;;  %s163_s1 = smov [#allocation7]  }
  0x27   :  { %v47_v2 = vld [vmem:[#allocation5] sm:$0xff]  ;;  %v48_v3 = vld [vmem:[#allocation5 + $0x8] sm:$0xff]  ;;  %s69_s6 = sshll.u32 %s163_s1, 4  ;;  %s70_s6 = int_to_ptr.vmem [resolvable:$true] %s69_s6 }
  0x28   :  { %vm49_vm0 = vcmp.gt.f32.partialorder %v47_v2, 0.5  ;;  %v53_v4 = vsub.f32 %v45_v0, %v47_v2  ;;  %vm50_vm1 = vcmp.gt.f32.partialorder %v48_v3, 0.5  ;;  %v54_v7 = vsub.f32 %v46_v1, %v48_v3  ;;  %s130_s7 = scalar_lea.vmem %s70_s6, 128  ;;  %p135_p3 = scmp.lt.s32.totalorder %s70_s6, %s70_s6 }
  0x29   :  { %v51_v6 = vsel %vm49_vm0, 2.0, %v162_v5  ;;  %v52_v8 = vsel %vm50_vm1, 2.0, %v162_v5  ;;  %p131_p2 = scmp.ne.s32.totalorder %s70_s6, %s130_s7  ;;  %p136_p4 = scmp.lt.s32.totalorder %s130_s7, %s130_s7 }
  0x2a   :  { %v55_v9 = vmul.f32 %v53_v4, %v53_v4  ;;  %v56_v10 = vmul.f32 %v54_v7, %v54_v7 }
  0x2b   :  { %p137_p5 = por %p136_p4, %p135_p3 }
  0x2c   :  { %v57_v11 = vmul.f32 %v55_v9, %v51_v6  ;;  %v58_v12 = vmul.f32 %v56_v10, %v52_v8 }
  0x2d   :  { %p138_p6 = pnand %p137_p5, %p131_p2 }
  0x2e   :  { %v60_v13 = vadd.f32 %v58_v12, %v57_v11 }
  0x30   :  { %62 = vst [vmem:[#allocation7] sm:$0xff] %v60_v13 }
  0x31   :  { %141 = shalt.err (!%p138_p6)
}
  0x32   :  { %s142_s10 = scalar_lea.hbm %s217_s2, 128 }
  0x33   :  { %p143_p7 = scmp.ne.s32.totalorder %s217_s2, %s142_s10  ;;  %p146_p8 = scmp.lt.u32.totalorder %s142_s10, %s217_s2 }
  0x35   :  { %p148_p9 = pnand %p146_p8, %p143_p7 }
  0x37   :  { %151 = shalt.err (!%p148_p9)
}
  0x38   :  { %72 = dma.vmem_to_hbm [thread:$0]  %s70_s6, 128, %s217_s2, [#allocation4]  }
  0x39   :  { %156 = dma.done.wait [#allocation4], 128  }
  0x3a   :  { %157 = vsyncadd [#allocation4], 4294967168 }
  0x3b   :  { %76 = vsyncpa [#allocation3], 1 }
  0x3c   :  { %77 = vsyncpa [#allocation6], 1 }
  0x3d   :  { %78 = vsyncpa [#allocation4], 1 }

</bundles_post_ra>
